<compile_context>
chip_gen: v7x
topology: tpu7x:2x2x1
jax: 0.10.0
libtpu: 0.0.40
codegen_flags: <defaults>
</compile_context>

<pallas_src>
import functools

import jax
import jax.numpy as jnp
from jax import lax
from jax.experimental import pallas as pl
from jax.experimental.pallas import tpu as pltpu


def _round_up(x, m):
    return ((x + m - 1) // m) * m


# ---------------------------------------------------------------------------
# Kernel
# ---------------------------------------------------------------------------
def actor_critic_kernel(n_actions, x_ref, w1_ref, b1_ref, w2_ref, b2_ref, out_ref):
    """Fused critic+actor MLP with softmax, writing one lane-dense output block.

    x_ref   : (TB, n_states)       caller dtype (f32, or bf16 if caller has bf16)
    w1_ref  : (n_states, HID_PAD)  fused [critic | actor | 0-pad] first layer
    b1_ref  : (1, HID_PAD)         f32
    w2_ref  : (HID_PAD, OUT_PAD)   block-diagonal fused second layer (always f32)
    b2_ref  : (1, OUT_PAD)         f32
    out_ref : (TB, OUT_PAD) out_dtype; lanes [0, n_actions) = probs,
              lane n_actions = value, remaining lanes = zero padding.
    """
    # In-kernel cast only (no-op when dtypes already match) -- avoids a separate
    # HBM read+write cast pass in the wrapper.
    x = x_ref[...].astype(w1_ref.dtype)

    # One fused first-layer matmul for both heads, full-lane-width bias + ReLU.
    h = jnp.dot(x, w1_ref[...], preferred_element_type=jnp.float32) + b1_ref[...]
    h = jnp.maximum(h, 0.0)

    # Second matmul in f32 (h is f32, w2 is f32): actor logits land in lanes
    # [0, n_actions), the critic value in lane n_actions, padded lanes exactly 0.
    y = jnp.dot(h, w2_ref[...], preferred_element_type=jnp.float32) + b2_ref[...]

    # Action-lane mask built once at (1, OUT_PAD) and broadcast.
    lane = lax.broadcasted_iota(jnp.int32, (1, y.shape[-1]), 1)
    is_action = lane < n_actions

    # Numerically-stable softmax restricted to the action lanes
    # (exp(-inf) == 0 in padding, so no probability mass leaks).
    logits = jnp.where(is_action, y, -jnp.inf)
    m = jnp.max(logits, axis=-1, keepdims=True)
    e = jnp.exp(logits - m)
    denom = jnp.sum(e, axis=-1, keepdims=True)

    # EUP approximate reciprocal + one Newton step (~f32 accuracy, off the VALU).
    inv = pl.reciprocal(denom, approx=True)
    inv = inv * (2.0 - denom * inv)
    probs = e * inv

    # Lane-dense packed store: probs in action lanes, raw y elsewhere
    # (lane n_actions of y is the critic value; remaining lanes are 0-pad).
    # f32 math throughout; cast only here if out_dtype is narrower.
    out_ref[...] = jnp.where(is_action, probs, y).astype(out_ref.dtype)


# ---------------------------------------------------------------------------
# Wrapper
# ---------------------------------------------------------------------------
def actor_critic_forward(x, fused_params, n_actions, *,
                         batch_tile=1024, out_dtype=jnp.float32,
                         return_packed=False):
    """Runs the fused ActorCritic forward pass.

    Returns (probs, value) by default:
      probs: (B, n_actions) out_dtype -- parameters of the Categorical distribution.
      value: (B, 1) out_dtype
    With return_packed=True, returns the lane-dense (B, OUT_PAD) slab directly
    (probs in lanes [0, n_actions), value in lane n_actions) so downstream code
    can avoid the extra slicing passes.
    """
    w1, b1, w2, b2 = fused_params
    B, n_states = x.shape
    hid_pad = w1.shape[1]
    out_pad = w2.shape[1]

    # Sublane granularity: 8 for 4-byte outputs, 16 for 2-byte (bf16) outputs.
    sub = 8 if jnp.dtype(out_dtype).itemsize >= 4 else 16

    if B > sub:
        # Ensure >= 2 grid steps so ("parallel",) can shard the batch across
        # v7x's two TensorCores, but cap the tile (overhead amortization) at
        # batch_tile for large batches. Neutral on v5e/v6e (1 TC).
        tb = min(_round_up(batch_tile, sub), _round_up(pl.cdiv(B, 2), sub))
    else:
        tb = sub
    grid = (pl.cdiv(B, tb),)  # ragged boundary tile handled by Pallas (no jnp.pad pass)

    def _nbytes(a):
        return a.size * jnp.dtype(a.dtype).itemsize

    cost = pl.CostEstimate(
        flops=2 * B * (n_states * hid_pad + hid_pad * out_pad),
        transcendentals=B * (out_pad + 1),
        bytes_accessed=(_nbytes(x) + _nbytes(w1) + _nbytes(b1) + _nbytes(w2)
                        + _nbytes(b2) + B * out_pad * jnp.dtype(out_dtype).itemsize),
    )

    kernel = functools.partial(actor_critic_kernel, n_actions)

    out = pl.pallas_call(
        kernel,
        out_shape=jax.ShapeDtypeStruct((B, out_pad), out_dtype),
        grid=grid,
        in_specs=[
            pl.BlockSpec((tb, n_states), lambda i: (i, 0)),       # x: tiled over batch
            pl.BlockSpec((n_states, hid_pad), lambda i: (0, 0)),  # weights stay resident
            pl.BlockSpec((1, hid_pad), lambda i: (0, 0)),
            pl.BlockSpec((hid_pad, out_pad), lambda i: (0, 0)),
            pl.BlockSpec((1, out_pad), lambda i: (0, 0)),
        ],
        out_specs=pl.BlockSpec((tb, out_pad), lambda i: (i, 0)),
        compiler_params=pltpu.CompilerParams(
            dimension_semantics=("parallel",),   # v7x: split batch tiles across 2 TCs
        ),
        cost_estimate=cost,
    )(x, w1, b1, w2, b2)

    if return_packed:
        return out
    probs = out[:, :n_actions]
    value = out[:, n_actions:n_actions + 1]
    return probs, value


# ---------------------------------------------------------------------------
# Parameter construction
# ---------------------------------------------------------------------------
def init_params(key, n_states, n_actions, hidden_dim):
    """Deterministic synthetic init. Weights stored as (in, out); biases (1, out)."""
    ks = jax.random.split(key, 8)

    def linear(kw, kb, fan_in, fan_out):
        # mimic PyTorch's default U(-1/sqrt(fan_in), 1/sqrt(fan_in)) init
        bound = 1.0 / jnp.sqrt(jnp.float32(fan_in))
        w = jax.random.uniform(kw, (fan_in, fan_out), jnp.float32, -bound, bound)
        b = jax.random.uniform(kb, (1, fan_out), jnp.float32, -bound, bound)
        return w, b

    wc1, bc1 = linear(ks[0], ks[1], n_states, hidden_dim)
    wc2, bc2 = linear(ks[2], ks[3], hidden_dim, 1)
    wa1, ba1 = linear(ks[4], ks[5], n_states, hidden_dim)
    wa2, ba2 = linear(ks[6], ks[7], hidden_dim, n_actions)
    return (wc1, bc1, wc2, bc2, wa1, ba1, wa2, ba2)


def fuse_params(params, n_states, n_actions, hidden_dim, *,
                weight_dtype=jnp.float32):
    """One-time fusion/padding/casting of actor+critic params for the fused kernel.

    Layout:
      w1 (n_states, HID_PAD):  cols [0,H)=wc1, [H,2H)=wa1, rest 0   (weight_dtype)
      b1 (1, HID_PAD):         same column layout as w1, rest 0      (f32)
      w2 (HID_PAD, OUT_PAD):   block-diagonal -- rows [0,H) x col n_actions = wc2,
                               rows [H,2H) x cols [0,n_actions) = wa2, rest 0 (f32)
      b2 (1, OUT_PAD):         cols [0,n_actions)=ba2, col n_actions=bc2, rest 0 (f32)

    weight_dtype=jnp.bfloat16 is the v6e/v7x fast path for the streamed first
    matmul; w2/b2 always stay f32 so activations are never quantized.
    Keep f32 on v5e (no bf16 VPU/EUP, kernel is HBM-bound anyway).

    Invariant relied on by the kernel's softmax masking: all columns >= n_actions+1
    of w2 and b2 are EXACTLY zero (padded lanes carry no bias, exp(-inf)=0).
    """
    wc1, bc1, wc2, bc2, wa1, ba1, wa2, ba2 = params
    H = hidden_dim
    hid_pad = _round_up(2 * H, 128)
    out_pad = _round_up(n_actions + 1, 128)
    assert out_pad >= n_actions + 1

    w1 = jnp.zeros((n_states, hid_pad), jnp.float32)
    w1 = w1.at[:, :H].set(wc1).at[:, H:2 * H].set(wa1)
    b1 = jnp.zeros((1, hid_pad), jnp.float32)
    b1 = b1.at[:, :H].set(bc1).at[:, H:2 * H].set(ba1)

    w2 = jnp.zeros((hid_pad, out_pad), jnp.float32)
    w2 = w2.at[:H, n_actions:n_actions + 1].set(wc2)
    w2 = w2.at[H:2 * H, :n_actions].set(wa2)
    b2 = jnp.zeros((1, out_pad), jnp.float32)
    b2 = b2.at[:, :n_actions].set(ba2).at[:, n_actions:n_actions + 1].set(bc2)

    # Cast once here (not per forward call).
    w1 = w1.astype(weight_dtype)
    return (w1, b1, w2, b2)


def reference_forward(x, params):
    """Pure-JAX reference (unfused) for correctness checking."""
    (wc1, bc1, wc2, bc2, wa1, ba1, wa2, ba2) = params
    h_c = jnp.maximum(x @ wc1 + bc1, 0.0)
    value = h_c @ wc2 + bc2
    h_a = jnp.maximum(x @ wa1 + ba1, 0.0)
    logits = h_a @ wa2 + ba2
    probs = jax.nn.softmax(logits, axis=1)
    return probs, value


# ---------------------------------------------------------------------------
# Demo / self-check
# ---------------------------------------------------------------------------
if __name__ == "__main__":
    key = jax.random.PRNGKey(0)
    k_param, k_x, k_x2, k_x3, k_x4 = jax.random.split(key, 5)

    n_states, n_actions, hidden_dim = 16, 8, 32
    params = init_params(k_param, n_states, n_actions, hidden_dim)
    fused = fuse_params(params, n_states, n_actions, hidden_dim)

    # --- f32, small aligned batch ---
    B = 8
    x = jax.random.normal(k_x, (B, n_states), jnp.float32)
    probs, value = actor_critic_forward(x, fused, n_actions)
    jax.block_until_ready((probs, value))
    probs_r, value_r = reference_forward(x, params)
    assert probs.shape == (B, n_actions)
    assert value.shape == (B, 1)
    assert jnp.allclose(probs, probs_r, atol=1e-5, rtol=1e-5)
    assert jnp.allclose(value, value_r, atol=1e-5, rtol=1e-5)
    assert jnp.allclose(jnp.sum(probs, axis=1), 1.0, atol=1e-5)

    # --- f32, ragged batch (exercises multi-tile grid + boundary-tile clipping) ---
    B2 = 13
    x2 = jax.random.normal(k_x2, (B2, n_states), jnp.float32)
    probs2, value2 = actor_critic_forward(x2, fused, n_actions)
    jax.block_until_ready((probs2, value2))
    probs2_r, value2_r = reference_forward(x2, params)
    assert probs2.shape == (B2, n_actions)
    assert value2.shape == (B2, 1)
    assert jnp.allclose(probs2, probs2_r, atol=1e-5, rtol=1e-5)
    assert jnp.allclose(value2, value2_r, atol=1e-5, rtol=1e-5)

    # --- bf16-weight fast path (v6e/v7x): w1 bf16, w2 f32, f32 accumulation ---
    B3 = 16
    x3 = jax.random.normal(k_x3, (B3, n_states), jnp.float32)
    fused_bf16 = fuse_params(params, n_states, n_actions, hidden_dim,
                             weight_dtype=jnp.bfloat16)
    probs3, value3 = actor_critic_forward(x3, fused_bf16, n_actions)
    jax.block_until_ready((probs3, value3))
    probs3_r, value3_r = reference_forward(x3, params)
    assert jnp.allclose(probs3, probs3_r, atol=2e-2, rtol=2e-2)
    assert jnp.allclose(value3, value3_r, atol=2e-2, rtol=2e-2)
    assert jnp.allclose(jnp.sum(probs3, axis=1), 1.0, atol=1e-4)

    # --- bf16 packed-output path (halves the dominant HBM write stream) ---
    B4 = 32
    x4 = jax.random.normal(k_x4, (B4, n_states), jnp.float32)
    probs4, value4 = actor_critic_forward(x4, fused, n_actions,
                                          out_dtype=jnp.bfloat16)
    jax.block_until_ready((probs4, value4))
    probs4_r, value4_r = reference_forward(x4, params)
    assert jnp.allclose(probs4.astype(jnp.float32), probs4_r, atol=2e-2, rtol=2e-2)
    assert jnp.allclose(value4.astype(jnp.float32), value4_r, atol=2e-2, rtol=2e-2)
    assert jnp.allclose(jnp.sum(probs4.astype(jnp.float32), axis=1), 1.0, atol=5e-2)

    print("KERNEL_OK")
</pallas_src>

<mosaic_0001>
module attributes {stable_mosaic.version = 11 : i64} {
  func.func @actor_critic_kernel(%arg0: i32, %arg1: memref<8x16xf32, #tpu.memory_space<vmem>>, %arg2: memref<16x128xf32, #tpu.memory_space<vmem>>, %arg3: memref<1x128xf32, #tpu.memory_space<vmem>>, %arg4: memref<128x128xf32, #tpu.memory_space<vmem>>, %arg5: memref<1x128xf32, #tpu.memory_space<vmem>>, %arg6: memref<8x128xf32, #tpu.memory_space<vmem>>) attributes {dimension_semantics = [#tpu.dimension_semantics<parallel>], iteration_bounds = array<i64: 1>, scalar_prefetch = 0 : i64, scratch_operands = 0 : i64, tpu.core_type = #tpu.core_type<tc>, window_params = [{transform_indices = @transform_0, window_bounds = array<i64: 8, 16>}, {pipeline_mode = #tpu.pipeline_mode<synchronous>, transform_indices = @transform_1, window_bounds = array<i64: 16, 128>}, {pipeline_mode = #tpu.pipeline_mode<synchronous>, transform_indices = @transform_2, window_bounds = array<i64: 1, 128>}, {pipeline_mode = #tpu.pipeline_mode<synchronous>, transform_indices = @transform_3, window_bounds = array<i64: 128, 128>}, {pipeline_mode = #tpu.pipeline_mode<synchronous>, transform_indices = @transform_4, window_bounds = array<i64: 1, 128>}, {transform_indices = @transform_5, window_bounds = array<i64: 8, 128>}]} {
    %c0 = arith.constant 0 : index
    %c0_0 = arith.constant 0 : index
    %0 = vector.load %arg1[%c0, %c0_0] : memref<8x16xf32, #tpu.memory_space<vmem>>, vector<8x16xf32>
    %c0_1 = arith.constant 0 : index
    %c0_2 = arith.constant 0 : index
    %1 = vector.load %arg2[%c0_1, %c0_2] : memref<16x128xf32, #tpu.memory_space<vmem>>, vector<16x128xf32>
    %cst = arith.constant dense<0.000000e+00> : vector<8x128xf32>
    %2 = tpu.matmul %0, %1, %cst {dimension_numbers = #tpu.dot_dimension_numbers<[1], [0], [0], [1], [0, 0, 1, 1], [], []>} : vector<8x16xf32>, vector<16x128xf32>, vector<8x128xf32> -> vector<8x128xf32>
    %c0_3 = arith.constant 0 : index
    %c0_4 = arith.constant 0 : index
    %3 = vector.load %arg3[%c0_3, %c0_4] : memref<1x128xf32, #tpu.memory_space<vmem>>, vector<1x128xf32>
    %4 = vector.broadcast %3 : vector<1x128xf32> to vector<8x128xf32>
    %5 = arith.addf %2, %4 : vector<8x128xf32>
    %cst_5 = arith.constant 0.000000e+00 : f32
    %6 = vector.broadcast %cst_5 : f32 to vector<8x128xf32>
    %7 = arith.maximumf %5, %6 : vector<8x128xf32>
    %c0_6 = arith.constant 0 : index
    %c0_7 = arith.constant 0 : index
    %8 = vector.load %arg4[%c0_6, %c0_7] : memref<128x128xf32, #tpu.memory_space<vmem>>, vector<128x128xf32>
    %cst_8 = arith.constant dense<0.000000e+00> : vector<8x128xf32>
    %9 = tpu.matmul %7, %8, %cst_8 {dimension_numbers = #tpu.dot_dimension_numbers<[1], [0], [0], [1], [0, 0, 1, 1], [], []>} : vector<8x128xf32>, vector<128x128xf32>, vector<8x128xf32> -> vector<8x128xf32>
    %c0_9 = arith.constant 0 : index
    %c0_10 = arith.constant 0 : index
    %10 = vector.load %arg5[%c0_9, %c0_10] : memref<1x128xf32, #tpu.memory_space<vmem>>, vector<1x128xf32>
    %11 = vector.broadcast %10 : vector<1x128xf32> to vector<8x128xf32>
    %12 = arith.addf %9, %11 : vector<8x128xf32>
    %13 = tpu.iota {dimensions = array<i32: 1>} : vector<1x128xi32>
    %c8_i32 = arith.constant 8 : i32
    %14 = vector.broadcast %c8_i32 : i32 to vector<1x128xi32>
    %15 = arith.cmpi slt, %13, %14 : vector<1x128xi32>
    %cst_11 = arith.constant 0xFF800000 : f32
    %16 = vector.shape_cast %15 : vector<1x128xi1> to vector<1x128xi1>
    %17 = vector.broadcast %16 : vector<1x128xi1> to vector<8x128xi1>
    %18 = vector.broadcast %cst_11 : f32 to vector<8x128xf32>
    %19 = arith.select %17, %12, %18 : vector<8x128xi1>, vector<8x128xf32>
    %cst_12 = arith.constant dense<0xFF800000> : vector<8xf32>
    %20 = vector.multi_reduction <maximumf>, %19, %cst_12 [1] : vector<8x128xf32> to vector<8xf32>
    %21 = vector.shape_cast %20 : vector<8xf32> to vector<8x1xf32>
    %22 = vector.broadcast %21 : vector<8x1xf32> to vector<8x128xf32>
    %23 = arith.subf %19, %22 : vector<8x128xf32>
    %24 = math.exp %23 : vector<8x128xf32>
    %cst_13 = arith.constant dense<0.000000e+00> : vector<8xf32>
    %25 = vector.multi_reduction <add>, %24, %cst_13 [1] : vector<8x128xf32> to vector<8xf32>
    %26 = vector.shape_cast %25 : vector<8xf32> to vector<8x1xf32>
    %27 = tpu.reciprocal %26 {approx = true} : vector<8x1xf32> -> vector<8x1xf32>
    %28 = arith.mulf %26, %27 : vector<8x1xf32>
    %cst_14 = arith.constant 2.000000e+00 : f32
    %29 = vector.broadcast %cst_14 : f32 to vector<8x1xf32>
    %30 = arith.subf %29, %28 : vector<8x1xf32>
    %31 = arith.mulf %27, %30 : vector<8x1xf32>
    %32 = vector.broadcast %31 : vector<8x1xf32> to vector<8x128xf32>
    %33 = arith.mulf %24, %32 : vector<8x128xf32>
    %34 = vector.shape_cast %15 : vector<1x128xi1> to vector<1x128xi1>
    %35 = vector.broadcast %34 : vector<1x128xi1> to vector<8x128xi1>
    %36 = arith.select %35, %33, %12 : vector<8x128xi1>, vector<8x128xf32>
    %c0_15 = arith.constant 0 : index
    %c0_16 = arith.constant 0 : index
    %37 = vector.load %arg6[%c0_15, %c0_16] : memref<8x128xf32, #tpu.memory_space<vmem>>, vector<8x128xf32>
    tpu.vector_store %arg6[%c0_15, %c0_16], %36 {strides = array<i32>} : memref<8x128xf32, #tpu.memory_space<vmem>>, vector<8x128xf32>,
    return
  }
  func.func @transform_0(%arg0: i32) -> (i32, i32) {
    %c0_i32 = arith.constant 0 : i32
    %c0_i32_0 = arith.constant 0 : i32
    return %arg0, %c0_i32 : i32, i32
  }
  func.func @transform_1(%arg0: i32) -> (i32, i32) {
    %c0_i32 = arith.constant 0 : i32
    %c0_i32_0 = arith.constant 0 : i32
    %c0_i32_1 = arith.constant 0 : i32
    return %c0_i32, %c0_i32_0 : i32, i32
  }
  func.func @transform_2(%arg0: i32) -> (i32, i32) {
    %c0_i32 = arith.constant 0 : i32
    %c0_i32_0 = arith.constant 0 : i32
    %c0_i32_1 = arith.constant 0 : i32
    return %c0_i32, %c0_i32_0 : i32, i32
  }
  func.func @transform_3(%arg0: i32) -> (i32, i32) {
    %c0_i32 = arith.constant 0 : i32
    %c0_i32_0 = arith.constant 0 : i32
    %c0_i32_1 = arith.constant 0 : i32
    return %c0_i32, %c0_i32_0 : i32, i32
  }
  func.func @transform_4(%arg0: i32) -> (i32, i32) {
    %c0_i32 = arith.constant 0 : i32
    %c0_i32_0 = arith.constant 0 : i32
    %c0_i32_1 = arith.constant 0 : i32
    return %c0_i32, %c0_i32_0 : i32, i32
  }
  func.func @transform_5(%arg0: i32) -> (i32, i32) {
    %c0_i32 = arith.constant 0 : i32
    %c0_i32_0 = arith.constant 0 : i32
    return %arg0, %c0_i32 : i32, i32
  }
}

</mosaic_0001>

<bundles_post_ra>
// kernel: tpu_custom_call.1
= control target key start
LH: loop header
LB: loop body
LE: loop exit
PB: predicated region body
PF: predicated region fallthrough
CT: control target
= control target key end

     0   :  { %10 = vsyncpa [#allocation3], 0  ;;  %s574_s0 = inlined_call_operand.hbm [shape: f32[8,16], index: 0, kind: input, shape index: {}]   ;;  %s575_s1 = inlined_call_operand.hbm [shape: f32[16,128], index: 1, kind: input, shape index: {}]   ;;  %s576_s2 = inlined_call_operand.vmem [shape: f32[1,128], index: 2, kind: input, shape index: {}]   ;;  %s577_s3 = inlined_call_operand.hbm [shape: f32[128,128], index: 3, kind: input, shape index: {}]   ;;  %s578_s4 = inlined_call_operand.vmem [shape: f32[1,128], index: 4, kind: input, shape index: {}]   ;;  %s579_s5 = inlined_call_operand.hbm [shape: f32[8,128], index: 5, kind: output, shape index: {}]  }
   0x1   :  { %11 = vsyncpa [#allocation6], 0 }
   0x2   :  { %12 = vsyncpa [#allocation4], 0  ;;  %s473_s18 = smov [#allocation5]   ;;  %s379_s22 = scalar_lea.hbm %s575_s1, 256 }
   0x3   :  { %s28_s19 = sshll.u32 %s473_s18, 4  ;;  %p380_p0 = scmp.ne.s32.totalorder %s575_s1, %s379_s22  ;;  %s29_s19 = int_to_ptr.vmem [resolvable:$true] %s28_s19 }
   0x4   :  { %p383_p1 = scmp.lt.u32.totalorder %s379_s22, %s575_s1 }
   0x6   :  { %p385_p2 = pnand %p383_p1, %p380_p0 }
   0x8   :  { %388 = shalt.err (!%p385_p2)
}
   0x9   :  { %s389_s27 = scalar_lea.vmem %s29_s19, 256  ;;  %p394_p4 = scmp.lt.s32.totalorder %s29_s19, %s29_s19 }
   0xa   :  { %p390_p3 = scmp.ne.s32.totalorder %s29_s19, %s389_s27  ;;  %p395_p5 = scmp.lt.s32.totalorder %s389_s27, %s389_s27 }
   0xc   :  { %p396_p6 = por %p395_p5, %p394_p4 }
   0xe   :  { %p397_p7 = pnand %p396_p6, %p390_p3 }
  0x10   :  { %400 = shalt.err (!%p397_p7)
}
  0x11   :  { %s474_s28 = smov 128   ;;  %s475_s29 = smov 8  }
  0x12   :  { %34 = dma.hbm_to_vmem [thread:$0]  %s575_s1, 256, %s29_s19, [#allocation6], %s474_s28, %s474_s28, %s475_s29  }
  0x13   :  { %s476_s7 = smov [#allocation2]   ;;  %s477_s9 = smov [#allocation7]  }
  0x14   :  { %s19_s8 = sshll.u32 %s476_s7, 4  ;;  %s42_s10 = sshll.u32 %s477_s9, 4  ;;  %s20_s8 = int_to_ptr.vmem [resolvable:$true] %s19_s8  ;;  %s43_s10 = int_to_ptr.vmem [resolvable:$true] %s42_s10 }
  0x15   :  { %s401_s13 = scalar_lea.hbm %s574_s0, 128 }
  0x16   :  { %p402_p8 = scmp.ne.s32.totalorder %s574_s0, %s401_s13  ;;  %p405_p9 = scmp.lt.u32.totalorder %s401_s13, %s574_s0 }
  0x18   :  { %p407_p10 = pnand %p405_p9, %p402_p8 }
  0x1a   :  { %410 = shalt.err (!%p407_p10)
}
  0x1b   :  { %s411_s1 = scalar_lea.vmem %s20_s8, 128  ;;  %p416_p12 = scmp.lt.s32.totalorder %s20_s8, %s20_s8 }
  0x1c   :  { %p412_p11 = scmp.ne.s32.totalorder %s20_s8, %s411_s1  ;;  %p417_p13 = scmp.lt.s32.totalorder %s411_s1, %s411_s1 }
  0x1e   :  { %p418_p0 = por %p417_p13, %p416_p12 }
  0x20   :  { %p419_p1 = pnand %p418_p0, %p412_p11 }
  0x22   :  { %422 = shalt.err (!%p419_p1)
}
  0x23   :  { %22 = dma.hbm_to_vmem [thread:$0]  %s574_s0, 128, %s20_s8, [#allocation3]  }
  0x24   :  { %s423_s22 = scalar_lea.hbm %s577_s3, 2048 }
  0x25   :  { %p424_p2 = scmp.ne.s32.totalorder %s577_s3, %s423_s22  ;;  %p427_p3 = scmp.lt.u32.totalorder %s423_s22, %s577_s3 }
  0x27   :  { %p429_p4 = pnand %p427_p3, %p424_p2 }
  0x29   :  { %432 = shalt.err (!%p429_p4)
}
  0x2a   :  { %s433_s27 = scalar_lea.vmem %s43_s10, 2048  ;;  %p438_p6 = scmp.lt.s32.totalorder %s43_s10, %s43_s10 }
  0x2b   :  { %p434_p5 = scmp.ne.s32.totalorder %s43_s10, %s433_s27  ;;  %p439_p7 = scmp.lt.s32.totalorder %s433_s27, %s433_s27 }
  0x2d   :  { %p440_p8 = por %p439_p7, %p438_p6 }
  0x2f   :  { %p441_p9 = pnand %p440_p8, %p434_p5 }
  0x31   :  { %444 = shalt.err (!%p441_p9)
}
  0x32   :  { %48 = dma.hbm_to_vmem [thread:$0]  %s577_s3, 2048, %s43_s10, [#allocation6], %s474_s28, %s474_s28, %s475_s29  }
  0x33   :  { %467 = dma.done.wait [#allocation3], 128  }
  0x34   :  { %468 = vsyncadd [#allocation3], 4294967168 }
  0x35   :  { %469 = dma.done.wait [#allocation6], 2304  }
  0x36   :  { %470 = vsyncadd [#allocation6], 4294964992  ;;  %v478_v0 = vmov 0.0|0.0   ;;  %vm479_vm0 = vmmov 0   ;;  %v480_v1 = vmov 0.0   ;;  %v61_v2 = vld [vmem:[#allocation5] sm:$0xff]  ;;  %v238_v35 = vlaneseq }
  0x37   :  { %339 = vmatprep.subr.bf16.mxu0 %v478_v0  ;;  %301 = vmatprep.mubr.msk.f32.mxu0 %vm479_vm0, %v480_v1  ;;  %v62_v3 = vld [vmem:[#allocation5 + $0x8] sm:$0xff]  ;;  %v145_v5 = vld [vmem:[#allocation7] sm:$0xff]  ;;  %v146_v6 = vld [vmem:[#allocation7 + $0x8] sm:$0xff]  ;;  %vm70_vm1 = vcmask 130048  }
  0x38   :  { %342 = vmatprep.subr.bf16.mxu1 %v478_v0  ;;  %336 = vmatprep.mubr.msk.f32.mxu1 %vm479_vm0, %v480_v1  ;;  %v340_v4 = vpack.c.bf16 %v62_v3, %v61_v2  ;;  %v147_v7 = vld [vmem:[#allocation7 + $0x10] sm:$0xff]  ;;  %v343_v8 = vpack.c.bf16 %v146_v6, %v145_v5  ;;  %v148_v9 = vld [vmem:[#allocation7 + $0x18] sm:$0xff]  ;;  %v60_v10 = vld [vmem:[#allocation2] sm:$0xff]  ;;  %v239_v36 = vand.u32 127, %v238_v35 }
  0x39   :  { %v346_v11 = vpack.c.bf16 %v148_v9, %v147_v7  ;;  %v149_v12 = vld [vmem:[#allocation7 + $0x20] sm:$0xff]  ;;  %v150_v13 = vld [vmem:[#allocation7 + $0x28] sm:$0xff]  ;;  %v151_v15 = vld [vmem:[#allocation7 + $0x30] sm:$0xff] }
  0x3a   :  { %341 = vmatpush3.bf16.msra.mxu0 %v340_v4  ;;  %344 = vmatpush3.bf16.msra.mxu1 %v343_v8  ;;  %v349_v14 = vpack.c.bf16 %v150_v13, %v149_v12  ;;  %v152_v16 = vld [vmem:[#allocation7 + $0x38] sm:$0xff]  ;;  %v153_v18 = vld [vmem:[#allocation7 + $0x40] sm:$0xff]  ;;  %v154_v19 = vld [vmem:[#allocation7 + $0x48] sm:$0xff]  ;;  %vm240_vm2 = vcmp.lt.s32.totalorder %v239_v36, 8 }
  0x3b   :  { %345 = vmatprep.subr.bf16.mxu1 %v478_v0  ;;  %v352_v17 = vpack.c.bf16 %v152_v16, %v151_v15  ;;  %v355_v20 = vpack.c.bf16 %v154_v19, %v153_v18  ;;  %v155_v21 = vld [vmem:[#allocation7 + $0x50] sm:$0xff]  ;;  %v156_v22 = vld [vmem:[#allocation7 + $0x58] sm:$0xff]  ;;  %v157_v24 = vld [vmem:[#allocation7 + $0x60] sm:$0xff] }
  0x3c   :  { %v358_v23 = vpack.c.bf16 %v156_v22, %v155_v21  ;;  %v158_v25 = vld [vmem:[#allocation7 + $0x68] sm:$0xff]  ;;  %v159_v27 = vld [vmem:[#allocation7 + $0x70] sm:$0xff]  ;;  %v160_v28 = vld [vmem:[#allocation7 + $0x78] sm:$0xff] }
  0x3d   :  { %302 = vmatmul.mubr.msk.f32.vlgmr.msra.gmra.mrb[0].mxu0 %vm70_vm1, %v60_v10  ;;  %v361_v26 = vpack.c.bf16 %v158_v25, %v157_v24  ;;  %v364_v29 = vpack.c.bf16 %v160_v28, %v159_v27  ;;  %v274_v30 = vld [vmem:[%s576_s2] ss:$0 sm:$0xff]  ;;  %s481_s2 = smov [#allocation8]  }
  0x3e   :  { %347 = vmatpush3.bf16.msra.mxu1 %v346_v11  ;;  %v276_v37 = vld [vmem:[%s578_s4] ss:$0 sm:$0xff]  ;;  %s264_s4 = sshll.u32 %s481_s2, 4  ;;  %s265_s4 = int_to_ptr.vmem [resolvable:$true] %s264_s4 }
  0x3f   :  { %348 = vmatprep.subr.bf16.mxu1 %v478_v0  ;;  %s445_s7 = scalar_lea.vmem %s265_s4, 128  ;;  %p450_p11 = scmp.lt.s32.totalorder %s265_s4, %s265_s4 }
  0x40   :  { %p446_p10 = scmp.ne.s32.totalorder %s265_s4, %s445_s7  ;;  %p451_p12 = scmp.lt.s32.totalorder %s445_s7, %s445_s7 }
  0x42   :  { %350 = vmatpush3.bf16.msra.mxu1 %v349_v14  ;;  %p452_p13 = por %p451_p12, %p450_p11 }
  0x43   :  { %351 = vmatprep.subr.bf16.mxu1 %v478_v0 }
  0x44   :  { %p453_p0 = pnand %p452_p13, %p446_p10 }
  0x46   :  { %353 = vmatpush3.bf16.msra.mxu1 %v352_v17 }
  0x47   :  { %354 = vmatprep.subr.bf16.mxu1 %v478_v0 }
  0x4a   :  { %356 = vmatpush3.bf16.msra.mxu1 %v355_v20 }
  0x4b   :  { %357 = vmatprep.subr.bf16.mxu1 %v478_v0 }
  0x4e   :  { %359 = vmatpush3.bf16.msra.mxu1 %v358_v23 }
  0x4f   :  { %360 = vmatprep.subr.bf16.mxu1 %v478_v0 }
  0x52   :  { %362 = vmatpush3.bf16.msra.mxu1 %v361_v26 }
  0x53   :  { %363 = vmatprep.subr.bf16.mxu1 %v478_v0 }
  0x56   :  { %365 = vmatpush3.bf16.msra.mxu1 %v364_v29 }
 0x110   :  { %v140_v31 = vpop.f32.mrb[0].mxu0 }
 0x111   :  { %v141_v32 = vadd.f32 %v274_v30, %v140_v31  ;;  %v303_v33 = vpop.f32.mrb[1].mxu0 }
 0x113   :  { %v144_v34 = vmax.f32 %v141_v32, 0.0 }
 0x115   :  { %337 = vmatmul.mubr.f32.vlgmr.msra.gmra.mrb[0].mxu1 %v144_v34 }
 0x1e8   :  { %v234_v38 = vpop.f32.mrb[0].mxu1 }
 0x1e9   :  { %v235_v39 = vadd.f32 %v276_v37, %v234_v38  ;;  %v338_v40 = vpop.f32.mrb[1].mxu1 }
 0x1eb   :  { %v243_v41 = vsel %vm240_vm2, %v235_v39, -inf }
 0x1ec   :  { %244 = vmax.xlane.f32.xlu0 %v243_v41 }
 0x279   :  { %v245_v42 = vpop.xlane.xlu0 %244 }
 0x27a   :  { %v246_v43 = vsub.f32 %v243_v41, %v245_v42 }
 0x27c   :  { %v247_v44 = vmul.f32 1.442695, %v246_v43 }
 0x27e   :  { %375 = vpow2.f32 %v247_v44 }
 0x288   :  { %v376_v45 = vpop.eup %375 }
 0x289   :  { %249 = vadd.xlane.f32.xlu0 %v376_v45 }
 0x316   :  { %v250_v46 = vpop.xlane.xlu0 %249 }
 0x317   :  { %377 = vrcp.f32 %v250_v46 }
 0x321   :  { %v378_v47 = vpop.eup %377 }
 0x322   :  { %v252_v48 = vmul.f32 %v378_v47, %v250_v46 }
 0x324   :  { %v253_v49 = vsub.f32 2.0, %v252_v48 }
 0x326   :  { %v254_v50 = vmul.f32 %v378_v47, %v253_v49 }
 0x328   :  { %v255_v51 = vmul.f32 %v376_v45, %v254_v50 }
 0x32a   :  { %v256_v52 = vsel %vm240_vm2, %v255_v51, %v235_v39 }
 0x32b   :  { %257 = vst [vmem:[#allocation8] sm:$0xff] %v256_v52 }
 0x32c   :  { %456 = shalt.err (!%p453_p0)
}
 0x32d   :  { %s457_s10 = scalar_lea.hbm %s579_s5, 128 }
 0x32e   :  { %p458_p1 = scmp.ne.s32.totalorder %s579_s5, %s457_s10  ;;  %p461_p2 = scmp.lt.u32.totalorder %s457_s10, %s579_s5 }
 0x330   :  { %p463_p3 = pnand %p461_p2, %p458_p1 }
 0x332   :  { %466 = shalt.err (!%p463_p3)
}
 0x333   :  { %267 = dma.vmem_to_hbm [thread:$0]  %s265_s4, 128, %s579_s5, [#allocation4]  }
 0x334   :  { %471 = dma.done.wait [#allocation4], 128  }
 0x335   :  { %472 = vsyncadd [#allocation4], 4294967168 }
 0x336   :  { %271 = vsyncpa [#allocation3], 1 }
 0x337   :  { %272 = vsyncpa [#allocation6], 1 }
 0x338   :  { %273 = vsyncpa [#allocation4], 1 }

</bundles_post_ra>
